<compile_context>
chip_gen: v7x
topology: tpu7x:2x2x1
jax: 0.10.0
libtpu: 0.0.40
codegen_flags: <defaults>
</compile_context>

<pallas_src>
import functools
import math

import jax
import jax.numpy as jnp
from jax.experimental import pallas as pl
from jax.experimental.pallas import tpu as pltpu

EPSILON = 1e-8
_LANE = 128
_SUBLANE = 8

# murmur3-style fmix32 constants as two's-complement int32.
_GOLD = -1640531527        # 0x9E3779B9
_GOLD2 = 1013904242        # 0x3C6EF372
_FMIX_C1 = -2048144789     # 0x85EBCA6B
_FMIX_C2 = -1028477387     # 0xC2B2AE35

# cos(t) Taylor coefficients over t^2 (valid to ~1e-7 for |t| <= pi).
_COS_COEFFS = (
    1.0, -1.0 / 2, 1.0 / 24, -1.0 / 720, 1.0 / 40320, -1.0 / 3628800,
    1.0 / 479001600, -1.0 / 87178291200, 1.0 / 20922789888000,
)


# ---------------------------------------------------------------------------
# Shape / hardware helpers.
# ---------------------------------------------------------------------------
def _round_up(x, m):
    return ((x + m - 1) // m) * m


def _wrap_i32(x):
    x = x % (1 << 32)
    return x - (1 << 32) if x >= (1 << 31) else x


@functools.lru_cache(maxsize=1)
def _vmem_limit_bytes():
    """Generation-aware scoped-VMEM limit (~3/4 of capacity, capped 96 MiB)."""
    try:
        info = pltpu.get_tpu_info()
        cap = int(getattr(info, "vmem_capacity_bytes", 64 * 1024 * 1024))
    except Exception:
        return 32 * 1024 * 1024          # conservative fallback (interpret/CPU)
    return max(32 * 1024 * 1024, min(cap * 3 // 4, 96 * 1024 * 1024))


def _default_max_tile():
    # 1024-wide tiles on 128-MiB parts (v5e/v6e); 512 on v7x / fallback.
    return 1024 if _vmem_limit_bytes() >= 64 * 1024 * 1024 else 512


def _tile_and_pad(dim, max_tile, align):
    """Pick a tile (multiple of `align`, capped at max_tile) and padded extent."""
    aligned = _round_up(dim, align)
    tile = min(max_tile, aligned)
    return tile, _round_up(dim, tile)


def _maybe_split_for_megacore(tile, padded, align, other_parallel_tiles):
    """Guarantee >=2 blocks on a parallel axis so v7x's 2nd TensorCore has work."""
    if other_parallel_tiles * (padded // tile) >= 2:
        return tile
    for cand in range(tile - align, 0, -align):
        if padded % cand == 0:
            return cand
    return tile


def _pad2d(a, rows, cols):
    r, c = a.shape
    if r == rows and c == cols:
        return a
    return jnp.pad(a, ((0, rows - r), (0, cols - c)))


# ---------------------------------------------------------------------------
# In-kernel counter-based PRNG (plain jnp ops only -> TPU + interpret safe).
# ---------------------------------------------------------------------------
def _lsr32(x, n):
    """Logical right shift for int32 values."""
    return jnp.bitwise_and(jnp.right_shift(x, n),
                           jnp.int32((1 << (32 - n)) - 1))


def _fmix32(x):
    x = jnp.bitwise_xor(x, _lsr32(x, 16))
    x = x * jnp.int32(_FMIX_C1)
    x = jnp.bitwise_xor(x, _lsr32(x, 13))
    x = x * jnp.int32(_FMIX_C2)
    x = jnp.bitwise_xor(x, _lsr32(x, 16))
    return x


def _cos_pi_range(t):
    """cos(t) for |t| <= pi via Taylor/Horner (VPU-only; no hw-cos dependency)."""
    t2 = t * t
    c = jnp.float32(_COS_COEFFS[-1])
    for a in reversed(_COS_COEFFS[:-1]):
        c = c * t2 + jnp.float32(a)
    return c


def _counter_normal(cnt, key1, key2):
    """Standard-normal draw per int32 counter (fmix32 hash + Box-Muller)."""
    h1 = _fmix32(jnp.bitwise_xor(cnt, key1))
    h2 = _fmix32(jnp.bitwise_xor(cnt, key2))
    m1 = jnp.bitwise_and(_lsr32(h1, 8), jnp.int32((1 << 23) - 1))
    m2 = jnp.bitwise_and(_lsr32(h2, 8), jnp.int32((1 << 23) - 1))
    u1 = (m1.astype(jnp.float32) + 0.5) * jnp.float32(1.0 / (1 << 23))
    u2 = (m2.astype(jnp.float32) + 0.5) * jnp.float32(1.0 / (1 << 23))
    r = jnp.sqrt(-2.0 * jnp.log(u1))
    t = jnp.float32(2.0 * math.pi) * (u2 - 0.5)      # in [-pi, pi)
    return r * (-_cos_pi_range(t))                    # cos(2*pi*u2) = -cos(t)


# ---------------------------------------------------------------------------
# Kernel 1: fused "sample parameters (in-kernel PRNG) + linear" forward pass.
#   grid = (batch tiles [parallel], out tiles [parallel], in tiles [arbitrary])
#   Output block is resident across the reduction axis -> accumulate in o_ref.
# ---------------------------------------------------------------------------
def _sampled_linear_kernel(seed_ref, x_ref, wm_ref, ws_ref, bm_ref, bs_ref,
                           o_ref, *, col_stride, bias_base):
    j = pl.program_id(1)
    k = pl.program_id(2)
    nk = pl.num_programs(2)
    tin, tout = wm_ref.shape

    @pl.when(k == 0)
    def _():
        o_ref[...] = jnp.zeros_like(o_ref)

    seed = seed_ref[0]
    key1 = _fmix32(jnp.bitwise_xor(seed, jnp.int32(_GOLD)))
    key2 = _fmix32(jnp.bitwise_xor(seed, jnp.int32(_GOLD2)))

    # Counters keyed on GLOBAL element indices: the same weight element draws
    # the same eps for every batch tile and for any tile decomposition.
    rows = jax.lax.broadcasted_iota(jnp.int32, (tin, tout), 0) + k * tin
    cols = jax.lax.broadcasted_iota(jnp.int32, (tin, tout), 1) + j * tout
    cnt = rows * col_stride + cols
    eps_w = _counter_normal(cnt, key1, key2)

    w = wm_ref[...].astype(jnp.float32) + ws_ref[...].astype(jnp.float32) * eps_w
    o_ref[...] += jnp.dot(x_ref[...].astype(jnp.float32), w,
                          preferred_element_type=jnp.float32)

    @pl.when(k == nk - 1)
    def _():
        cols_b = jax.lax.broadcasted_iota(jnp.int32, (1, tout), 1) + j * tout
        eps_b = _counter_normal(cols_b + jnp.int32(bias_base), key1, key2)
        b = (bm_ref[...].astype(jnp.float32)
             + bs_ref[...].astype(jnp.float32) * eps_b)
        o_ref[...] += b


def _variational_linear_sample_impl(x, w_mean, w_std, b_mean, b_std, seed, *,
                                    batch_tile=None, in_tile=None,
                                    out_tile=None, dtype=jnp.float32):
    B, In = x.shape
    Out = w_mean.shape[1]
    max_tile = _default_max_tile()
    in_tile = in_tile or max_tile
    out_tile = out_tile or max_tile
    batch_tile = batch_tile or 256

    tm, b_p = _tile_and_pad(B, batch_tile, _SUBLANE)
    tin, in_p = _tile_and_pad(In, in_tile, _LANE)
    tout, out_p = _tile_and_pad(Out, out_tile, _LANE)
    m_tiles = b_p // tm
    tout = _maybe_split_for_megacore(tout, out_p, _LANE, m_tiles)

    x_p = _pad2d(x.astype(dtype), b_p, in_p)
    wm = _pad2d(w_mean.astype(dtype), in_p, out_p)
    ws = _pad2d(w_std.astype(dtype), in_p, out_p)
    bm = _pad2d(b_mean.astype(dtype), 1, out_p)
    bs = _pad2d(b_std.astype(dtype), 1, out_p)
    seed_arr = jnp.asarray(seed, jnp.int32).reshape((1,))

    # Counter geometry is tied to the lane-aligned logical shape (NOT the tile
    # choice) so the random stream is reproducible across tilings.
    col_stride = _round_up(Out, _LANE)
    bias_base = _wrap_i32(_round_up(In, _LANE) * col_stride)

    kernel = functools.partial(_sampled_linear_kernel,
                               col_stride=col_stride, bias_base=bias_base)
    out = pl.pallas_call(
        kernel,
        out_shape=jax.ShapeDtypeStruct((b_p, out_p), jnp.float32),
        grid_spec=pltpu.PrefetchScalarGridSpec(
            num_scalar_prefetch=1,
            grid=(m_tiles, out_p // tout, in_p // tin),
            in_specs=[
                pl.BlockSpec((tm, tin), lambda m, j, k, s: (m, k)),
                pl.BlockSpec((tin, tout), lambda m, j, k, s: (k, j)),
                pl.BlockSpec((tin, tout), lambda m, j, k, s: (k, j)),
                pl.BlockSpec((1, tout), lambda m, j, k, s: (0, j)),
                pl.BlockSpec((1, tout), lambda m, j, k, s: (0, j)),
            ],
            out_specs=pl.BlockSpec((tm, tout), lambda m, j, k, s: (m, j)),
        ),
        compiler_params=pltpu.CompilerParams(
            dimension_semantics=("parallel", "parallel", "arbitrary"),
            vmem_limit_bytes=_vmem_limit_bytes()),
    )(seed_arr, x_p, wm, ws, bm, bs)
    return out[:B, :Out]


variational_linear_sample = jax.jit(
    _variational_linear_sample_impl,
    static_argnames=("batch_tile", "in_tile", "out_tile", "dtype"))


# ---------------------------------------------------------------------------
# Kernel 2: deterministic (mean-parameter) forward: y = x @ w_mean + b_mean.
# ---------------------------------------------------------------------------
def _mean_linear_kernel(x_ref, wm_ref, bm_ref, o_ref):
    k = pl.program_id(2)

    @pl.when(k == 0)
    def _():
        o_ref[...] = jnp.zeros_like(o_ref)

    o_ref[...] += jnp.dot(x_ref[...], wm_ref[...],
                          preferred_element_type=jnp.float32)

    @pl.when(k == pl.num_programs(2) - 1)
    def _():
        o_ref[...] += bm_ref[...].astype(jnp.float32)


def _variational_linear_mean_impl(x, w_mean, b_mean, *, batch_tile=None,
                                  in_tile=None, out_tile=None,
                                  dtype=jnp.float32):
    B, In = x.shape
    Out = w_mean.shape[1]
    max_tile = _default_max_tile()
    in_tile = in_tile or max_tile
    out_tile = out_tile or max_tile
    batch_tile = batch_tile or 256

    tm, b_p = _tile_and_pad(B, batch_tile, _SUBLANE)
    tin, in_p = _tile_and_pad(In, in_tile, _LANE)
    tout, out_p = _tile_and_pad(Out, out_tile, _LANE)
    m_tiles = b_p // tm
    tout = _maybe_split_for_megacore(tout, out_p, _LANE, m_tiles)

    x_p = _pad2d(x.astype(dtype), b_p, in_p)
    wm = _pad2d(w_mean.astype(dtype), in_p, out_p)
    bm = _pad2d(b_mean.astype(dtype), 1, out_p)

    out = pl.pallas_call(
        _mean_linear_kernel,
        out_shape=jax.ShapeDtypeStruct((b_p, out_p), jnp.float32),
        grid_spec=pltpu.PrefetchScalarGridSpec(
            num_scalar_prefetch=0,
            grid=(m_tiles, out_p // tout, in_p // tin),
            in_specs=[
                pl.BlockSpec((tm, tin), lambda m, j, k: (m, k)),
                pl.BlockSpec((tin, tout), lambda m, j, k: (k, j)),
                pl.BlockSpec((1, tout), lambda m, j, k: (0, j)),
            ],
            out_specs=pl.BlockSpec((tm, tout), lambda m, j, k: (m, j)),
        ),
        compiler_params=pltpu.CompilerParams(
            dimension_semantics=("parallel", "parallel", "arbitrary"),
            vmem_limit_bytes=_vmem_limit_bytes()),
    )(x_p, wm, bm)
    return out[:B, :Out]


variational_linear_mean = jax.jit(
    _variational_linear_mean_impl,
    static_argnames=("batch_tile", "in_tile", "out_tile", "dtype"))


# ---------------------------------------------------------------------------
# Kernel 3: KL( N(q_mean, exp(q_logvar)) || N(p_mean, exp(p_logvar)) ) summed
# over a 2-D parameter block.  Per-row-tile lane-dense (8,128) partial sums so
# the row axis can run in parallel (v7x megacore); wrapper sums the partials.
# ---------------------------------------------------------------------------
def _fold_partial(per):
    tr, tc = per.shape
    folded = per.reshape(tr // _SUBLANE, _SUBLANE, tc // _LANE, _LANE)
    return jnp.sum(folded, axis=(0, 2))                 # (8, 128)


def _kl_kernel(qm_ref, qlv_ref, pm_ref, plv_ref, o_ref, *, epsilon):
    j = pl.program_id(1)

    @pl.when(j == 0)
    def _():
        o_ref[...] = jnp.zeros_like(o_ref)

    q_var = jnp.exp(qlv_ref[...])
    p_var = jnp.exp(plv_ref[...])
    diff = qm_ref[...] - pm_ref[...]
    per = 0.5 * (plv_ref[...] - qlv_ref[...]
                 + (q_var + diff * diff) / (p_var + epsilon) - 1.0)
    o_ref[...] += _fold_partial(per)[None]


def _kl_std_prior_kernel(qm_ref, qlv_ref, o_ref, *, inv_prior_var):
    j = pl.program_id(1)

    @pl.when(j == 0)
    def _():
        o_ref[...] = jnp.zeros_like(o_ref)

    qlv = qlv_ref[...]
    qm = qm_ref[...]
    per = 0.5 * ((jnp.exp(qlv) + qm * qm) * inv_prior_var - qlv - 1.0)
    o_ref[...] += _fold_partial(per)[None]


def _kl_call(kernel, arrays, r_p, c_p, tr, tc):
    n_r = r_p // tr
    return pl.pallas_call(
        kernel,
        out_shape=jax.ShapeDtypeStruct((n_r, _SUBLANE, _LANE), jnp.float32),
        grid_spec=pltpu.PrefetchScalarGridSpec(
            num_scalar_prefetch=0,
            grid=(n_r, c_p // tc),
            in_specs=[pl.BlockSpec((tr, tc), lambda i, j: (i, j))] * len(arrays),
            out_specs=pl.BlockSpec((1, _SUBLANE, _LANE), lambda i, j: (i, 0, 0)),
        ),
        compiler_params=pltpu.CompilerParams(
            dimension_semantics=("parallel", "arbitrary"),
            vmem_limit_bytes=_vmem_limit_bytes()),
    )(*arrays)


def _kl_geometry(R, C, row_tile, col_tile):
    max_tile = _default_max_tile()
    row_tile = row_tile or max_tile
    col_tile = col_tile or max_tile
    tr, r_p = _tile_and_pad(R, row_tile, _SUBLANE)
    tc, c_p = _tile_and_pad(C, col_tile, _LANE)
    tr = _maybe_split_for_megacore(tr, r_p, _SUBLANE, 1)
    return tr, r_p, tc, c_p


def _gaussian_kl_sum_impl(q_mean, q_logvar, p_mean, p_logvar, *,
                          epsilon=EPSILON, row_tile=None, col_tile=None):
    R, C = q_mean.shape
    tr, r_p, tc, c_p = _kl_geometry(R, C, row_tile, col_tile)
    pad = lambda a: _pad2d(a.astype(jnp.float32), r_p, c_p)
    # Zero-padded elements contribute ~-0.5*eps/(1+eps) ~ -5e-9 each: negligible.
    out = _kl_call(functools.partial(_kl_kernel, epsilon=float(epsilon)),
                   (pad(q_mean), pad(q_logvar), pad(p_mean), pad(p_logvar)),
                   r_p, c_p, tr, tc)
    return jnp.sum(out)


def _gaussian_kl_sum_std_prior_impl(q_mean, q_logvar, *, epsilon=EPSILON,
                                    row_tile=None, col_tile=None):
    R, C = q_mean.shape
    tr, r_p, tc, c_p = _kl_geometry(R, C, row_tile, col_tile)
    pad = lambda a: _pad2d(a.astype(jnp.float32), r_p, c_p)
    kernel = functools.partial(_kl_std_prior_kernel,
                               inv_prior_var=float(1.0 / (1.0 + epsilon)))
    out = _kl_call(kernel, (pad(q_mean), pad(q_logvar)), r_p, c_p, tr, tc)
    return jnp.sum(out)


gaussian_kl_sum = jax.jit(
    _gaussian_kl_sum_impl, static_argnames=("epsilon", "row_tile", "col_tile"))
gaussian_kl_sum_std_prior = jax.jit(
    _gaussian_kl_sum_std_prior_impl,
    static_argnames=("epsilon", "row_tile", "col_tile"))


# ---------------------------------------------------------------------------
# Thin JAX-side wrapper mirroring the VariationalLayer interface.
# Weights stored natively as [In, Out], bias as [1, Out] (no per-call .T);
# exp(0.5*logvar) cached once per parameter update (not recomputed in-kernel).
# ---------------------------------------------------------------------------
class MeanFieldVariationalLinear:
    def __init__(self, in_features, out_features, key, epsilon=EPSILON,
                 initial_logvar=-6.0, stream_dtype=jnp.float32):
        self.epsilon = float(epsilon)
        self.in_features = in_features
        self.out_features = out_features
        self.stream_dtype = stream_dtype
        k1, k2 = jax.random.split(key)
        bound = 1.0 / math.sqrt(in_features)
        self.w_mean = jax.random.uniform(k1, (in_features, out_features),
                                         jnp.float32, -bound, bound)
        self.w_logvar = jnp.full((in_features, out_features), initial_logvar,
                                 jnp.float32)
        self.b_mean = jax.random.uniform(k2, (1, out_features), jnp.float32,
                                         -bound, bound)
        self.b_logvar = jnp.full((1, out_features), initial_logvar, jnp.float32)
        # Prior: standard normal N(0, 1) (log-var = 0).
        self.prior_w_mean = jnp.zeros_like(self.w_mean)
        self.prior_w_logvar = jnp.zeros_like(self.w_logvar)
        self.prior_b_mean = jnp.zeros_like(self.b_mean)
        self.prior_b_logvar = jnp.zeros_like(self.b_logvar)
        self._prior_is_standard_normal = True
        self.refresh_cached_std()

    def refresh_cached_std(self):
        """Call after any update to *_logvar (keeps exp() off the kernel EUP)."""
        self.w_std = jnp.exp(0.5 * self.w_logvar)
        self.b_std = jnp.exp(0.5 * self.b_logvar)

    def forward(self, x, sample_parameters=True, seed=0):
        if sample_parameters:
            return variational_linear_sample(
                x, self.w_mean, self.w_std, self.b_mean, self.b_std, seed,
                dtype=self.stream_dtype)
        return variational_linear_mean(x, self.w_mean, self.b_mean,
                                       dtype=self.stream_dtype)

    def kl_divergence(self):
        if self._prior_is_standard_normal:
            kl_w = gaussian_kl_sum_std_prior(self.w_mean, self.w_logvar,
                                             epsilon=self.epsilon)
        else:
            kl_w = gaussian_kl_sum(self.w_mean, self.w_logvar,
                                   self.prior_w_mean, self.prior_w_logvar,
                                   epsilon=self.epsilon)
        # Bias KL: only `out_features` scalars -> dedicated kernel launch is
        # pure overhead; compute inline.
        kl_b = 0.5 * jnp.sum(
            self.prior_b_logvar - self.b_logvar
            + (jnp.exp(self.b_logvar) + (self.b_mean - self.prior_b_mean) ** 2)
            / (jnp.exp(self.prior_b_logvar) + self.epsilon) - 1.0)
        return kl_w + kl_b

    def reset_for_next_task(self):
        # Online VI: the current posterior becomes the prior for the next task.
        self.prior_w_mean = self.w_mean
        self.prior_w_logvar = self.w_logvar
        self.prior_b_mean = self.b_mean
        self.prior_b_logvar = self.b_logvar
        self._prior_is_standard_normal = False

    def get_statistics(self):
        return {
            "w_mean_mean": float(jnp.mean(self.w_mean)),
            "w_var_mean": float(jnp.mean(jnp.exp(self.w_logvar))),
            "b_mean_mean": float(jnp.mean(self.b_mean)),
            "b_var_mean": float(jnp.mean(jnp.exp(self.b_logvar))),
        }

# TODO(synk): local-reparameterization variant (eps only [B,Out]) would change
# the random stream, so it is intentionally not substituted here.


# ---------------------------------------------------------------------------
# Self-test.
# ---------------------------------------------------------------------------
def _ref_kl(qm, qlv, pm, plv, eps):
    return 0.5 * jnp.sum(plv - qlv + (jnp.exp(qlv) + (qm - pm) ** 2)
                         / (jnp.exp(plv) + eps) - 1.0)


if __name__ == "__main__":
    key = jax.random.PRNGKey(0)
    k_layer, k_x, k_x2 = jax.random.split(key, 3)

    B, In, Out = 8, 256, 256
    layer = MeanFieldVariationalLinear(In, Out, k_layer)
    x = jax.random.normal(k_x, (B, In), jnp.float32)

    # --- deterministic (mean-parameter) path --------------------------------
    y_mean = jax.block_until_ready(layer.forward(x, sample_parameters=False))
    y_mean_ref = x @ layer.w_mean + layer.b_mean
    assert jnp.allclose(y_mean, y_mean_ref, atol=1e-3, rtol=1e-4)

    # exercise an explicit multi-tile grid
    y_mean_tiled = variational_linear_mean(x, layer.w_mean, layer.b_mean,
                                           in_tile=128, out_tile=128)
    assert jnp.allclose(y_mean_tiled, y_mean_ref, atol=1e-3, rtol=1e-4)

    # bf16 streaming option (memory-bound path; loose tolerance)
    y_bf16 = variational_linear_mean(x, layer.w_mean, layer.b_mean,
                                     dtype=jnp.bfloat16)
    assert jnp.allclose(y_bf16, y_mean_ref, atol=3e-2, rtol=3e-2)

    # padding / unaligned-shape path
    xu = jax.random.normal(k_x2, (5, 40), jnp.float32)
    wu = 0.1 * jax.random.normal(jax.random.PRNGKey(1), (40, 24), jnp.float32)
    bu = 0.1 * jax.random.normal(jax.random.PRNGKey(2), (1, 24), jnp.float32)
    yu = variational_linear_mean(xu, wu, bu)
    assert jnp.allclose(yu, xu @ wu + bu, atol=1e-3, rtol=1e-4)

    # --- sampled path (in-kernel counter-based PRNG) ------------------------
    y_s0 = jax.block_until_ready(layer.forward(x, sample_parameters=True, seed=0))
    y_s0b = layer.forward(x, sample_parameters=True, seed=0)
    y_s1 = layer.forward(x, sample_parameters=True, seed=1)
    assert jnp.array_equal(y_s0, y_s0b), "same seed must be deterministic"
    assert not jnp.allclose(y_s0, y_s1), "different seeds must differ"

    # random stream is invariant to the tile decomposition
    y_s0_tiled = variational_linear_sample(
        x, layer.w_mean, layer.w_std, layer.b_mean, layer.b_std, 0,
        in_tile=128, out_tile=128)
    assert jnp.allclose(y_s0_tiled, y_s0, atol=1e-3, rtol=1e-4)

    var_pred = (x * x) @ jnp.exp(layer.w_logvar) + jnp.exp(layer.b_logvar)
    std_pred = jnp.sqrt(var_pred)
    assert bool(jnp.all(jnp.abs(y_s0 - y_mean_ref) < 8.0 * std_pred + 1e-3))

    n_samples = 64
    samples = jnp.stack([layer.forward(x, sample_parameters=True, seed=s)
                         for s in range(n_samples)])
    emp_mean = samples.mean(axis=0)
    emp_var = samples.var(axis=0, ddof=1)
    assert bool(jnp.all(jnp.abs(emp_mean - y_mean_ref)
                        <= 7.0 * std_pred / math.sqrt(n_samples) + 1e-3))
    ratio = float(jnp.mean(emp_var / var_pred))
    assert 0.8 < ratio < 1.25, f"sample variance ratio {ratio}"

    # --- KL divergence -------------------------------------------------------
    kl = jax.block_until_ready(layer.kl_divergence())   # std-normal-prior path
    kl_ref = (_ref_kl(layer.w_mean, layer.w_logvar,
                      layer.prior_w_mean, layer.prior_w_logvar, EPSILON)
              + _ref_kl(layer.b_mean, layer.b_logvar,
                        layer.prior_b_mean, layer.prior_b_logvar, EPSILON))
    assert jnp.allclose(kl, kl_ref, rtol=1e-4, atol=1e-2)

    # general-prior kernel, explicit multi-tile grid
    kl_gen = gaussian_kl_sum(layer.w_mean, layer.w_logvar,
                             layer.prior_w_mean, layer.prior_w_logvar,
                             epsilon=EPSILON, row_tile=128, col_tile=128)
    kl_gen_ref = _ref_kl(layer.w_mean, layer.w_logvar,
                         layer.prior_w_mean, layer.prior_w_logvar, EPSILON)
    assert jnp.allclose(kl_gen, kl_gen_ref, rtol=1e-4, atol=1e-2)

    # unaligned KL (padding path), non-trivial prior
    qm = 0.5 * jax.random.normal(jax.random.PRNGKey(3), (40, 24), jnp.float32)
    qlv = -1.0 + 0.1 * jax.random.normal(jax.random.PRNGKey(4), (40, 24),
                                         jnp.float32)
    pm = 0.1 * jax.random.normal(jax.random.PRNGKey(5), (40, 24), jnp.float32)
    plv = -0.5 * jnp.ones_like(qlv)
    kl_u = gaussian_kl_sum(qm, qlv, pm, plv, epsilon=EPSILON)
    assert jnp.allclose(kl_u, _ref_kl(qm, qlv, pm, plv, EPSILON),
                        rtol=1e-4, atol=1e-2)

    # --- task boundary --------------------------------------------------------
    assert float(kl) > 0.0
    layer.reset_for_next_task()
    assert bool(jnp.array_equal(layer.prior_w_mean, layer.w_mean))
    kl_after = float(layer.kl_divergence())              # general-prior path
    assert abs(kl_after) < 1.0, f"post-reset KL {kl_after}"
    _ = layer.get_statistics()

    print("KERNEL_OK")
</pallas_src>

<mosaic_0001>
module attributes {stable_mosaic.version = 11 : i64} {
  func.func @_mean_linear_kernel(%arg0: i32, %arg1: i32, %arg2: i32, %arg3: memref<8x256xf32, #tpu.memory_space<vmem>>, %arg4: memref<256x128xf32, #tpu.memory_space<vmem>>, %arg5: memref<1x128xf32, #tpu.memory_space<vmem>>, %arg6: memref<8x128xf32, #tpu.memory_space<vmem>>) attributes {dimension_semantics = [#tpu.dimension_semantics<parallel>, #tpu.dimension_semantics<parallel>, #tpu.dimension_semantics<arbitrary>], iteration_bounds = array<i64: 1, 2, 1>, scalar_prefetch = 0 : i64, scratch_operands = 0 : i64, tpu.core_type = #tpu.core_type<tc>, window_params = [{transform_indices = @transform_0, window_bounds = array<i64: 8, 256>}, {transform_indices = @transform_1, window_bounds = array<i64: 256, 128>}, {transform_indices = @transform_2, window_bounds = array<i64: 1, 128>}, {transform_indices = @transform_3, window_bounds = array<i64: 8, 128>}]} {
    %c0_i32 = arith.constant 0 : i32
    %0 = arith.cmpi eq, %arg2, %c0_i32 : i32
    %1 = arith.extui %0 : i1 to i32
    %c0_i32_0 = arith.constant 0 : i32
    %2 = arith.cmpi ne, %1, %c0_i32_0 : i32
    scf.if %2 {
      %cst_10 = arith.constant 0.000000e+00 : f32
      %12 = vector.broadcast %cst_10 : f32 to vector<8x128xf32>
      %c0_11 = arith.constant 0 : index
      %c0_12 = arith.constant 0 : index
      %13 = vector.load %arg6[%c0_11, %c0_12] : memref<8x128xf32, #tpu.memory_space<vmem>>, vector<8x128xf32>
      tpu.vector_store %arg6[%c0_11, %c0_12], %12 {strides = array<i32>} : memref<8x128xf32, #tpu.memory_space<vmem>>, vector<8x128xf32>,
    } else {
    }
    %c0 = arith.constant 0 : index
    %c0_1 = arith.constant 0 : index
    %3 = vector.load %arg6[%c0, %c0_1] : memref<8x128xf32, #tpu.memory_space<vmem>>, vector<8x128xf32>
    %c0_2 = arith.constant 0 : index
    %c0_3 = arith.constant 0 : index
    %4 = vector.load %arg3[%c0_2, %c0_3] : memref<8x256xf32, #tpu.memory_space<vmem>>, vector<8x256xf32>
    %c0_4 = arith.constant 0 : index
    %c0_5 = arith.constant 0 : index
    %5 = vector.load %arg4[%c0_4, %c0_5] : memref<256x128xf32, #tpu.memory_space<vmem>>, vector<256x128xf32>
    %cst = arith.constant dense<0.000000e+00> : vector<8x128xf32>
    %6 = tpu.matmul %4, %5, %cst {dimension_numbers = #tpu.dot_dimension_numbers<[1], [0], [0], [1], [0, 0, 1, 1], [], []>} : vector<8x256xf32>, vector<256x128xf32>, vector<8x128xf32> -> vector<8x128xf32>
    %7 = arith.addf %3, %6 : vector<8x128xf32>
    %c0_6 = arith.constant 0 : index
    %c0_7 = arith.constant 0 : index
    %8 = vector.load %arg6[%c0_6, %c0_7] : memref<8x128xf32, #tpu.memory_space<vmem>>, vector<8x128xf32>
    tpu.vector_store %arg6[%c0_6, %c0_7], %7 {strides = array<i32>} : memref<8x128xf32, #tpu.memory_space<vmem>>, vector<8x128xf32>,
    %c0_i32_8 = arith.constant 0 : i32
    %9 = arith.cmpi eq, %arg2, %c0_i32_8 : i32
    %10 = arith.extui %9 : i1 to i32
    %c0_i32_9 = arith.constant 0 : i32
    %11 = arith.cmpi ne, %10, %c0_i32_9 : i32
    scf.if %11 {
      %c0_10 = arith.constant 0 : index
      %c0_11 = arith.constant 0 : index
      %12 = vector.load %arg6[%c0_10, %c0_11] : memref<8x128xf32, #tpu.memory_space<vmem>>, vector<8x128xf32>
      %c0_12 = arith.constant 0 : index
      %c0_13 = arith.constant 0 : index
      %13 = vector.load %arg5[%c0_12, %c0_13] : memref<1x128xf32, #tpu.memory_space<vmem>>, vector<1x128xf32>
      %14 = vector.broadcast %13 : vector<1x128xf32> to vector<8x128xf32>
      %15 = arith.addf %12, %14 : vector<8x128xf32>
      %c0_14 = arith.constant 0 : index
      %c0_15 = arith.constant 0 : index
      %16 = vector.load %arg6[%c0_14, %c0_15] : memref<8x128xf32, #tpu.memory_space<vmem>>, vector<8x128xf32>
      tpu.vector_store %arg6[%c0_14, %c0_15], %15 {strides = array<i32>} : memref<8x128xf32, #tpu.memory_space<vmem>>, vector<8x128xf32>,
    } else {
    }
    return
  }
  func.func @transform_0(%arg0: i32, %arg1: i32, %arg2: i32) -> (i32, i32) {
    %c0_i32 = arith.constant 0 : i32
    return %arg0, %arg2 : i32, i32
  }
  func.func @transform_1(%arg0: i32, %arg1: i32, %arg2: i32) -> (i32, i32) {
    %c0_i32 = arith.constant 0 : i32
    return %arg2, %arg1 : i32, i32
  }
  func.func @transform_2(%arg0: i32, %arg1: i32, %arg2: i32) -> (i32, i32) {
    %c0_i32 = arith.constant 0 : i32
    %c0_i32_0 = arith.constant 0 : i32
    return %c0_i32, %arg1 : i32, i32
  }
  func.func @transform_3(%arg0: i32, %arg1: i32, %arg2: i32) -> (i32, i32) {
    %c0_i32 = arith.constant 0 : i32
    return %arg0, %arg1 : i32, i32
  }
}

</mosaic_0001>

<bundles_post_ra>
// kernel: _variational_linear_mean_impl.1
= control target key start
LH: loop header
LB: loop body
LE: loop exit
PB: predicated region body
PF: predicated region fallthrough
CT: control target
= control target key end

     0   :  { %8 = vsyncpa [#allocation3], 0  ;;  %s1098_s0 = inlined_call_operand.hbm [shape: f32[8,256], index: 0, kind: input, shape index: {}]   ;;  %s1099_s1 = inlined_call_operand.hbm [shape: f32[256,256], index: 1, kind: input, shape index: {}]   ;;  %s1100_s2 = inlined_call_operand.vmem [shape: f32[1,256], index: 2, kind: input, shape index: {}]   ;;  %s1101_s3 = inlined_call_operand.hbm [shape: f32[8,256], index: 3, kind: output, shape index: {}]  }
   0x1   :  { %9 = vsyncpa [#allocation6], 0 }
   0x2   :  { %11 = vsyncpa [#allocation6 + $0x1], 0 }
   0x3   :  { %12 = vsyncpa [#allocation4], 0 }
   0x4   :  { %14 = vsyncpa [#allocation4 + $0x1], 0  ;;  %s839_s12 = smov 0   ;;  %s841_s13 = smov 0  }
   0x5   :  { %s843_s14 = smov 0   ;;  %s845_s15 = smov 0  }
   0x6   :  { %s847_s16 = smov 0   ;;  %s849_s17 = smov 0  }
   0x7 LB: > { %s507_s18 = sadd.s32 4294967295, %s811_s17   ;;  %s508_s19 = sadd.s32 4294967294, %s811_s17   ;;  %s811_s17 = sphi %s849_s17, %s20_s17   ;;  %s807_s16 = sphi %s847_s16, %s1129_s16   ;;  %s803_s15 = sphi %s845_s15, %s1128_s15   ;;  %s799_s14 = sphi %s843_s14, %s1127_s14   ;;  %s795_s13 = sphi %s841_s13, %s1126_s13   ;;  %s791_s12 = sphi %s839_s12, %s1125_s12  }
   0x8   : > { %s76_s20 = sadd.s32 1, %s799_s14  ;;  %p83_p0 = scmp.ne.s32.totalorder %s799_s14, %s795_s13 }
   0x9   : > { %p84_p1 = scmp.eq.s32.totalorder %s811_s17, 0  ;;  %p89_p2 = scmp.ne.s32.totalorder %s795_s13, %s791_s12 }
   0xa   : > { %p877_p3 = scmp.eq.s32.totalorder %s507_s18, 0  ;;  %p141_p4 = scmp.eq.s32.totalorder %s507_s18, 1 }
   0xb   : > { %p881_p5 = por %p84_p1, %p83_p0  ;;  %p147_p6 = scmp.eq.s32.totalorder %s508_s19, 1 }
   0xc   : > { %s1108_s21 = scalar_select %p877_p3, 1, 0 }
   0xd   : > { %p887_p7 = por %p877_p3, %p89_p2  ;;  %p891_p8 = por %p141_p4, %p83_p0 }
   0xe   : > { %p895_p9 = por %p147_p6, %p89_p2  ;;  %p509_p10 = scmp.ge.s32.totalorder %s811_s17, 1 }
   0xf   : > { %s1110_s23 = scalar_select %p887_p7, 1, 0 }
  0x10   : > { %s1111_s24 = scalar_select %p891_p8, 1, 0 }
  0x11   : > { %s1112_s25 = scalar_select %p895_p9, 1, 0 }
  0x12   : > { %p154_p11 = scmp.lt.s32.totalorder %s811_s17, 3  ;;  %s813_s27 = smov [#allocation2]  }
  0x13   : > { %s172_s28 = sshll.u32 %s813_s27, 4  ;;  %p611_p1 = scmp.lt.s32.totalorder %s811_s17, 2  ;;  %s173_s28 = int_to_ptr.vmem [resolvable:$true] %s172_s28 }
  0x14   : > { %p902_p13 = pnand %p509_p10, %p154_p11  ;;  %s35_s4 = sadd.s32 1, %s807_s16 }
  0x15   : > { %p911_p4 = pnand %p611_p1, %p881_p5  ;;  %p922_p6 = scmp.ge.s32.totalorder %s35_s4, 2 }
  0x16   : > { %s1113_s26 = scalar_select %p902_p13, 1, 0 }
  0x17   : > { %p598_p0 = pneg %p902_p13  ;;  %s183_s6 = sand.u32 1, %s799_s14  }
  0x18   : > { %s1114_s29 = scalar_select %p911_p4, 1, 0 }
  0x19   : > { %p917_p2 = pnand %p598_p0, %p877_p3  ;;  %s667_s9 = scalar_lea.hbm %s1098_s0, 256 }
  0x1a   : > { %s1116_s5 = scalar_select %p922_p6, 1, 0 }
  0x1b   : > { %p668_p5 = scmp.ne.s32.totalorder %s1098_s0, %s667_s9  ;;  %p669_p10 = pneg %p917_p2 }
  0x1c   : > { %p674_p0 = scmp.lt.u32.totalorder %s667_s9, %s1098_s0 }
  0x1d   : > { %p670_p11 = pnand %p669_p10, %p668_p5 }
  0x1f   : > { %p671_p1 = pneg %p670_p11 }
  0x21   : > { %p676_p12 = pnand %p674_p0, %p671_p1 }
  0x23   : > { %679 = shalt.err (!%p676_p12)
}
  0x24   : > { %s680_s22 = scalar_lea.vmem %s173_s28, 256  ;;  %p688_p3 = scmp.lt.s32.totalorder %s173_s28, %s173_s28 }
  0x25   : > { %p681_p9 = scmp.ne.s32.totalorder %s173_s28, %s680_s22  ;;  %p689_p13 = scmp.lt.s32.totalorder %s680_s22, %s680_s22 }
  0x27   : > { %p683_p8 = pnand %p681_p9, %p669_p10  ;;  %p690_p4 = por %p689_p13, %p688_p3 }
  0x29   : > { %p684_p7 = pneg %p683_p8 }
  0x2b   : > { %p691_p6 = pnand %p690_p4, %p684_p7 }
  0x2d   : > { %694 = shalt.err (!%p691_p6)
}
  0x2e   : > { %601 = dma.hbm_to_vmem [thread:$0]  (!%p917_p2), %s1098_s0, 256, %s173_s28, [#allocation3]  }
  0x2f   : > { %p1117_p9 = scmp.ne.s32.totalorder %s1116_s5, 0  ;;  %s512_s8 = sshll.u32 %s183_s6, 8 }
  0x30   : > { %s513_s10 = sshll.u32 %s807_s16, 7  ;;  %s187_s19 = scalar_lea.vmem [#allocation5], %s512_s8 }
  0x31   : > { %s1131_s4 = smov (%p1117_p9, %s35_s4), 0  ;;  %s953_s18 = scalar_lea.hbm %s1099_s1, %s513_s10 }
  0x32   : > { %s72_s9 = ssub.s32 %s807_s16, %s1131_s4  ;;  %s196_s22 = sshll.u32 %s187_s19, 4  ;;  %s960_s22 = int_to_ptr.vmem [resolvable:$true] %s196_s22 }
  0x33   : > { %p74_p3 = scmp.eq.s32.totalorder %s72_s9, 0  ;;  %s962_s5 = scalar_lea.sflag [#allocation6], %s183_s6 }
  0x34   : > { %s695_s27 = scalar_lea.hbm %s953_s18, 4096  ;;  %p1118_p8 = scmp.ne.s32.totalorder %s1114_s29, 0 }
  0x35   : > { %s958_s28 = scalar_select %p74_p3, %s799_s14, %s76_s20  }
  0x36   : > { %p696_p7 = scmp.ne.s32.totalorder %s953_s18, %s695_s27  ;;  %p697_p12 = pneg %p1118_p8 }
  0x37   : > { %s700_s8 = scalar_lea.hbm %s1099_s1, 8192  ;;  %p701_p2 = scmp.lt.u32.totalorder %s953_s18, %s1099_s1 }
  0x38   : > { %p698_p13 = pnand %p697_p12, %p696_p7  ;;  %p702_p6 = scmp.lt.u32.totalorder %s700_s8, %s695_s27 }
  0x39   : > { %p704_p10 = scmp.lt.u32.totalorder %s695_s27, %s953_s18 }
  0x3a   : > { %p699_p4 = pneg %p698_p13  ;;  %p703_p5 = por %p702_p6, %p701_p2 }
  0x3c   : > { %p705_p11 = por %p704_p10, %p703_p5 }
  0x3e   : > { %p706_p1 = pnand %p705_p11, %p699_p4 }
  0x40   : > { %709 = shalt.err (!%p706_p1)
}
  0x41   : > { %s710_s20 = scalar_lea.vmem %s960_s22, 4096  ;;  %s814_s6 = smov [#allocation5]  }
  0x42   : > { %p711_p0 = scmp.ne.s32.totalorder %s960_s22, %s710_s20  ;;  %s715_s11 = sshll.u32 %s814_s6, 4  ;;  %s716_s11 = int_to_ptr.vmem [resolvable:$false] %s715_s11 }
  0x43   : > { %s717_s19 = scalar_lea.vmem %s716_s11, 8192  ;;  %p718_p7 = scmp.lt.s32.totalorder %s960_s22, %s716_s11 }
  0x44   : > { %p713_p9 = pnand %p711_p0, %p697_p12  ;;  %p719_p13 = scmp.lt.s32.totalorder %s717_s19, %s710_s20 }
  0x46   : > { %p714_p3 = pneg %p713_p9  ;;  %p720_p2 = por %p719_p13, %p718_p7 }
  0x48   : > { %p721_p6 = pnand %p720_p2, %p714_p3 }
  0x4a   : > { %724 = shalt.err (!%p721_p6)
}
  0x4b   : > { %s815_s27 = smov 256   ;;  %s816_s7 = smov 128  }
  0x4c   : > { %s817_s9 = smov 8   ;;  %p1119_p12 = scmp.ne.s32.totalorder %s1113_s26, 0 }
  0x4d   : > { %605 = dma.hbm_to_vmem [thread:$0]  (!%p1118_p8), %s953_s18, 4096, %s960_s22, %s962_s5, %s815_s27, %s816_s7, %s817_s9  }
  0x4e   : > { %214 = sbr.rel (%p1119_p12) target bundleno = 356 (0x164), region = 32  ;;  %p1120_p4 = scmp.ne.s32.totalorder (!%p1119_p12), %s1108_s21, 0 }
  0x55   : > { %778 = dma.done.wait (%p1120_p4), [#allocation3], 256  }
  0x56   : > { %780 = vsyncadd (%p1120_p4), [#allocation3], 4294967040  ;;  %s997_s8 = sand.u32 1, %s795_s13   ;;  %p1121_p8 = scmp.ne.s32.totalorder %s1110_s23, 0 }
  0x57   : > { %s516_s10 = sshll.u32 %s997_s8, 8  ;;  %s221_s30 = scalar_lea.sflag [#allocation6], %s997_s8 }
  0x58   : > { %s1001_s20 = scalar_lea.vmem [#allocation5], %s516_s10 }
  0x59   : > { %782 = dma.done.wait (%p1121_p8), %s221_s30, 4096  }
  0x5a   : > { %784 = vsyncadd (%p1121_p8), %s221_s30, 4294963200  ;;  %v279_v0 = vld [vmem:[%s1001_s20 + $0x80] sm:$0xff]  ;;  %v280_v1 = vld [vmem:[%s1001_s20 + $0x88] sm:$0xff]  ;;  %p252_p5 = scmp.lt.s32.totalorder %s803_s15, 1  ;;  %s517_s23 = sshll.u32 %s997_s8, 3 }
  0x5b   : > { %v263_v2 = vld [vmem:[%s1001_s20] sm:$0xff]  ;;  %v558_v3 = vpack.c.bf16 %v280_v1, %v279_v0  ;;  %v264_v4 = vld [vmem:[%s1001_s20 + $0x8] sm:$0xff]  ;;  %v281_v5 = vld [vmem:[%s1001_s20 + $0x90] sm:$0xff]  ;;  %s520_s22 = sshll.u32 %s803_s15, 7  ;;  %s249_s5 = scalar_lea.vmem [#allocation7], %s517_s23 }
  0x5c   : > { %v282_v6 = vld [vmem:[%s1001_s20 + $0x98] sm:$0xff]  ;;  %v560_v7 = vpack.c.bf16 %v264_v4, %v263_v2  ;;  %v265_v9 = vld [vmem:[%s1001_s20 + $0x10] sm:$0xff]  ;;  %v283_v11 = vld [vmem:[%s1001_s20 + $0xa0] sm:$0xff]  ;;  %s253_s21 = scalar_select %p252_p5, %s803_s15, 1 }
  0x5d   : > { %v562_v8 = vpack.c.bf16 %v282_v6, %v281_v5  ;;  %v266_v10 = vld [vmem:[%s1001_s20 + $0x18] sm:$0xff]  ;;  %559 = vmatprep.subr.bf16.mxu0 %v558_v3  ;;  %v284_v12 = vld [vmem:[%s1001_s20 + $0xa8] sm:$0xff]  ;;  %v267_v15 = vld [vmem:[%s1001_s20 + $0x20] sm:$0xff]  ;;  %s396_s6 = sshll.u32 %s249_s5, 4  ;;  %s1049_s27 = scalar_lea.hbm %s1101_s3, %s520_s22  ;;  %s1051_s6 = int_to_ptr.vmem [resolvable:$true] %s396_s6 }
  0x5e   : > { %561 = vmatpush3.bf16.msra.mxu0 %v560_v7  ;;  %v564_v13 = vpack.c.bf16 %v266_v10, %v265_v9  ;;  %v566_v14 = vpack.c.bf16 %v284_v12, %v283_v11  ;;  %v268_v16 = vld [vmem:[%s1001_s20 + $0x28] sm:$0xff]  ;;  %v285_v17 = vld [vmem:[%s1001_s20 + $0xb0] sm:$0xff]  ;;  %v286_v18 = vld [vmem:[%s1001_s20 + $0xb8] sm:$0xff]  ;;  %s254_s18 = scalar_lea.vmem %s1100_s2, %s253_s21  ;;  %s381_s7 = scalar_lea.sflag [#allocation4], %s997_s8 }
  0x5f   : > { %563 = vmatprep.subr.bf16.mxu0 %v562_v8  ;;  %v568_v19 = vpack.c.bf16 %v268_v16, %v267_v15  ;;  %v570_v20 = vpack.c.bf16 %v286_v18, %v285_v17  ;;  %v269_v21 = vld [vmem:[%s1001_s20 + $0x30] sm:$0xff]  ;;  %v270_v22 = vld [vmem:[%s1001_s20 + $0x38] sm:$0xff]  ;;  %v287_v23 = vld [vmem:[%s1001_s20 + $0xc0] sm:$0xff]  ;;  %s725_s9 = scalar_lea.vmem %s1051_s6, 128  ;;  %p1122_p11 = scmp.ne.s32.totalorder %s1111_s24, 0 }
  0x60   : > { %v288_v24 = vld [vmem:[%s1001_s20 + $0xc8] sm:$0xff]  ;;  %v262_v25 = vld [vmem:[#allocation2 + $0x8] sm:$0xff]  ;;  %v572_v26 = vpack.c.bf16 %v270_v22, %v269_v21  ;;  %v271_v28 = vld [vmem:[%s1001_s20 + $0x40] sm:$0xff]  ;;  %p726_p10 = scmp.ne.s32.totalorder %s1051_s6, %s725_s9  ;;  %s818_s15 = smov [#allocation7]  }
  0x61   : > { %359 = vmatprep.mubr.f32.mxu0 %v262_v25  ;;  %v574_v27 = vpack.c.bf16 %v288_v24, %v287_v23  ;;  %v272_v29 = vld [vmem:[%s1001_s20 + $0x48] sm:$0xff]  ;;  %v289_v30 = vld [vmem:[%s1001_s20 + $0xd0] sm:$0xff]  ;;  %v290_v31 = vld [vmem:[%s1001_s20 + $0xd8] sm:$0xff]  ;;  %s729_s10 = sshll.u32 %s818_s15, 4  ;;  %s730_s10 = int_to_ptr.vmem [resolvable:$false] %s729_s10 }
  0x62   : > { %565 = vmatpush3.bf16.msra.mxu0 %v564_v13  ;;  %v576_v32 = vpack.c.bf16 %v272_v29, %v271_v28  ;;  %v578_v33 = vpack.c.bf16 %v290_v31, %v289_v30  ;;  %v273_v34 = vld [vmem:[%s1001_s20 + $0x50] sm:$0xff]  ;;  %v274_v35 = vld [vmem:[%s1001_s20 + $0x58] sm:$0xff]  ;;  %v291_v36 = vld [vmem:[%s1001_s20 + $0xe0] sm:$0xff]  ;;  %p727_p1 = pnand %p726_p10, %p1122_p11  ;;  %s731_s30 = scalar_lea.vmem %s730_s10, 256 }
  0x63   : > { %567 = vmatprep.subr.bf16.mxu0 %v566_v14  ;;  %v292_v37 = vld [vmem:[%s1001_s20 + $0xe8] sm:$0xff]  ;;  %v580_v38 = vpack.c.bf16 %v274_v35, %v273_v34  ;;  %v275_v40 = vld [vmem:[%s1001_s20 + $0x60] sm:$0xff]  ;;  %v293_v42 = vld [vmem:[%s1001_s20 + $0xf0] sm:$0xff]  ;;  %p732_p9 = scmp.lt.s32.totalorder %s1051_s6, %s730_s10  ;;  %p733_p3 = scmp.lt.s32.totalorder %s731_s30, %s725_s9 }
  0x64   : > { %v582_v39 = vpack.c.bf16 %v292_v37, %v291_v36  ;;  %v276_v41 = vld [vmem:[%s1001_s20 + $0x68] sm:$0xff]  ;;  %v294_v43 = vld [vmem:[%s1001_s20 + $0xf8] sm:$0xff]  ;;  %v277_v46 = vld [vmem:[%s1001_s20 + $0x70] sm:$0xff]  ;;  %p728_p0 = pneg %p727_p1 }
  0x65   : > { %v584_v44 = vpack.c.bf16 %v276_v41, %v275_v40  ;;  %v586_v45 = vpack.c.bf16 %v294_v43, %v293_v42  ;;  %v278_v47 = vld [vmem:[%s1001_s20 + $0x78] sm:$0xff]  ;;  %v261_v49 = vld [vmem:[#allocation2] sm:$0xff]  ;;  %p734_p7 = por %p733_p3, %p732_p9 }
  0x66   : > { %569 = vmatpush3.bf16.msra.mxu0 %v568_v19  ;;  %v588_v48 = vpack.c.bf16 %v278_v47, %v277_v46  ;;  %v518_v53 = vld [vmem:[%s254_s18] ss:$0 sm:$0xff] }
  0x67   : > { %571 = vmatprep.subr.bf16.mxu0 %v570_v20  ;;  %p735_p13 = pnand %p734_p7, %p728_p0 }
  0x6a   : > { %573 = vmatpush3.bf16.msra.mxu0 %v572_v26 }
  0x6b   : > { %575 = vmatprep.subr.bf16.mxu0 %v574_v27 }
  0x6e   : > { %577 = vmatpush3.bf16.msra.mxu0 %v576_v32 }
  0x6f   : > { %579 = vmatprep.subr.bf16.mxu0 %v578_v33 }
  0x72   : > { %581 = vmatpush3.bf16.msra.mxu0 %v580_v38 }
  0x73   : > { %583 = vmatprep.subr.bf16.mxu0 %v582_v39 }
  0x76   : > { %585 = vmatpush3.bf16.msra.mxu0 %v584_v44 }
  0x77   : > { %587 = vmatprep.subr.bf16.mxu0 %v586_v45 }
  0x7a   : > { %589 = vmatpush3.bf16.msra.mxu0 %v588_v48 }
  0x7d   : > { %360 = vmatmul.mubr.f32.vlgmr.msra.gmra.mrb[0].mxu0 %v261_v49 }
 0x150   : > { %v555_v50 = vpop.f32.mrb[0].mxu0 }
 0x151   : > { %v556_v51 = vpop.f32.mrb[1].mxu0 }
 0x152   : > { %v557_v52 = vadd.f32 %v556_v51, %v555_v50 }
 0x154   : > { %v378_v54 = vadd.f32 %v557_v52, %v518_v53 }
 0x156   : > { %379 = vst [vmem:[%s249_s5] sm:$0xff] %v378_v54 }
 0x157   : > { %738 = shalt.err (!%p735_p13)
}
 0x158   : > { %s739_s8 = scalar_lea.hbm %s1049_s27, 128  ;;  %s743_s23 = scalar_lea.hbm %s1101_s3, 256 }
 0x159   : > { %p740_p2 = scmp.ne.s32.totalorder %s1049_s27, %s739_s8  ;;  %p744_p4 = scmp.lt.u32.totalorder %s1049_s27, %s1101_s3 }
 0x15a   : > { %p745_p8 = scmp.lt.u32.totalorder %s743_s23, %s739_s8  ;;  %p747_p10 = scmp.lt.u32.totalorder %s739_s8, %s1049_s27 }
 0x15b   : > { %p741_p6 = pnand %p740_p2, %p1122_p11 }
 0x15c   : > { %p746_p5 = por %p745_p8, %p744_p4 }
 0x15d   : > { %p742_p12 = pneg %p741_p6 }
 0x15e   : > { %p748_p1 = por %p747_p10, %p746_p5 }
 0x160   : > { %p749_p0 = pnand %p748_p1, %p742_p12 }
 0x162   : > { %752 = shalt.err (!%p749_p0)
}
 0x163   : > { %596 = dma.vmem_to_hbm [thread:$0]  (%p1122_p11), %s1051_s6, 128, %s1049_s27, %s381_s7  }
 0x164 PF: > { %s408_s18 = sand.u32 1, %s791_s12   ;;  %p1123_p9 = scmp.ne.s32.totalorder %s1112_s25, 0 }
 0x165   : > { %p1124_p3 = scmp.ge.s32.totalorder %s811_s17, 2  ;;  %s409_s22 = scalar_lea.sflag [#allocation4], %s408_s18 }
 0x167   : > { %p607_p7 = pnand %p1124_p3, %p1123_p9 }
 0x169   : > { %786 = dma.done.wait (!%p607_p7), %s409_s22, 128  }
 0x16a   : > { %788 = vsyncadd (!%p607_p7), %s409_s22, 4294967168  ;;  %s20_s17 = sadd.s32 1, %s811_s17   ;;  %s1125_s12 = smov %s795_s13 }
 0x16b   : > { %p17_p13 = scmp.ge.s32.totalorder %s20_s17, 4   ;;  %s1126_s13 = smov %s799_s14 }
 0x16c   : > { %s1127_s14 = smov %s958_s28  ;;  %s1128_s15 = smov %s807_s16 }
 0x16d   : > { %s1129_s16 = smov %s1131_s4  ;;  %19 = sbr.rel (!%p17_p13) target bundleno = 7 (0x7), region = 94 }
 0x174   :  { %414 = vsyncpa [#allocation3], 1 }
 0x175   :  { %416 = vsyncpa [#allocation3 + $0x1], 1 }
 0x176   :  { %417 = vsyncpa [#allocation6], 1 }
 0x177   :  { %419 = vsyncpa [#allocation6 + $0x1], 1 }
 0x178   :  { %420 = vsyncpa [#allocation4], 1 }
 0x179   :  { %422 = vsyncpa [#allocation4 + $0x1], 1 }

</bundles_post_ra>
